<compile_context>
chip_gen: v7x
topology: tpu7x:2x2x1
jax: 0.10.0
libtpu: 0.0.40
codegen_flags: <defaults>
</compile_context>

<pallas_src>
import jax
import jax.numpy as jnp
from jax.experimental import pallas as pl
from jax.experimental.pallas import tpu as pltpu

_ALIGN = 8      # batch rides sublanes in batch-major blocks -> align to 8
_LANE = 128


def _round_up(x, m):
    return ((x + m - 1) // m) * m


def stageone2_tab_kernel(x_ref,     # (TILE_B, 49)  batch-major input tile (f32 or bf16)
                         w1_ref,    # (49, 128)     l1 weight [in, out], VMEM-resident
                         b1_ref,    # (1, 128)      l1 bias, f32, VMEM-resident
                         weff_ref,  # (128, 1)      collapsed 128->1 head, f32, resident
                         beff_ref,  # (1, 1)        collapsed bias, SMEM scalar
                         out_ref):  # (TILE_B, 1)   output tile
    # TabEncoder.l1 + ReLU  (Dropout(0.5) is identity in eval mode).
    h = jnp.dot(x_ref[...], w1_ref[...],
                preferred_element_type=jnp.float32)          # (TILE_B, 128) f32
    h = jnp.maximum(h + b1_ref[...], 0.0)
    # Collapsed affine tail (l2 -> SS.t_sh/t_sp -> softmax fusion -> c1) as a
    # second MXU matvec; the MXU has huge slack at K=49 so this is free and it
    # keeps the VPU down to just the bias-add + ReLU above.
    out = jnp.dot(h, weff_ref[...], preferred_element_type=jnp.float32)
    out_ref[...] = out + beff_ref[0, 0]


def stageone2_tab_forward(t, params, *, tile_b=8192):
    """StageOne2_Tab.forward(None, t, y) in eval mode.

    t: [B, 49]. Streamed in its own dtype (pass bf16 to halve HBM traffic on
    every TPU generation; MXU accumulation is f32 regardless).
    params: dict; Linear weights stored as [in, out]. Returns [B, 1] float32.
    """
    B, F = t.shape
    assert F == 49
    f32 = jnp.float32
    itemsize = jnp.dtype(t.dtype).itemsize

    # ---- fold the post-ReLU affine chain once, outside the kernel ----------
    w = jax.nn.softmax(params["weight"].astype(f32), axis=-1)            # (2,)
    w_fused = w[0] * params["wsp"] + w[1] * params["wsh"]                # (128, 128)
    b_fused = w[0] * params["bsp"] + w[1] * params["bsh"]                # (1, 128)
    w_eff = (params["w2"] @ w_fused @ params["wc1"]).astype(f32)         # (128, 1)
    b_eff = ((params["b2"] @ w_fused + b_fused) @ params["wc1"]
             + params["bc1"]).astype(f32).reshape(1, 1)                  # (1, 1)

    # ---- batch tile selection (VMEM-budgeted, >=2 grid steps when possible) -
    # Per-batch-row VMEM: lane-padded input (x2 buffers) + f32 out (x2 buffers)
    # + f32 h / elementwise / matvec temps (~3 slabs).
    per_row_vmem = _LANE * (2 * itemsize + 5 * 4)
    vmem_budget = 40 * 1024 * 1024
    tile_b = _round_up(max(int(tile_b), _ALIGN), _ALIGN)    # robust to odd requests
    tile_b = min(tile_b, _round_up(B, _ALIGN))
    tile_b = min(tile_b, max(_ALIGN, (vmem_budget // per_row_vmem) // _ALIGN * _ALIGN))
    if pl.cdiv(B, tile_b) < 2 and B >= 2 * _ALIGN:
        # v7x megacore: ensure at least two grid steps so both TensorCores work.
        tile_b = _round_up(pl.cdiv(_round_up(B, _ALIGN), 2), _ALIGN)

    b_pad = _round_up(B, tile_b)
    x = t if b_pad == B else jnp.pad(t, ((0, b_pad - B), (0, 0)))
    num_tiles = b_pad // tile_b

    w1 = params["w1"].astype(t.dtype)                                    # (49, 128)
    b1 = params["b1"].reshape(1, 128).astype(f32)                        # (1, 128)

    flops = 2 * b_pad * (49 * 128 + 128)
    bytes_accessed = (b_pad * 49 * itemsize + b_pad * 4
                      + 49 * 128 * itemsize + (128 + 128 + 1) * 4)
    vmem_limit = int(min(48 * 1024 * 1024,
                         max(32 * 1024 * 1024,
                             tile_b * per_row_vmem + 16 * 1024 * 1024)))

    out = pl.pallas_call(
        stageone2_tab_kernel,
        out_shape=jax.ShapeDtypeStruct((b_pad, 1), f32),
        grid=(num_tiles,),
        in_specs=[
            pl.BlockSpec((tile_b, 49), lambda i: (i, 0)),        # streamed input tile
            pl.BlockSpec((49, 128), lambda i: (0, 0)),           # resident l1 weight
            pl.BlockSpec((1, 128), lambda i: (0, 0)),            # resident l1 bias
            pl.BlockSpec((128, 1), lambda i: (0, 0)),            # resident collapsed head
            pl.BlockSpec(memory_space=pltpu.MemorySpace.SMEM),   # collapsed bias scalar
        ],
        out_specs=pl.BlockSpec((tile_b, 1), lambda i: (i, 0)),
        compiler_params=pltpu.CompilerParams(
            dimension_semantics=("parallel",),                   # megacore on v7x
            vmem_limit_bytes=vmem_limit,
        ),
        cost_estimate=pl.CostEstimate(flops=flops, transcendentals=0,
                                      bytes_accessed=bytes_accessed),
    )(x, w1, b1, w_eff, b_eff)

    return out[:B]


def init_params(key):
    """Deterministic synthetic init (kaiming-normal-like for Linear weights)."""
    ks = jax.random.split(key, 12)

    def kaiming(k, fan_in, fan_out):
        # kaiming_normal_(mode='fan_out', nonlinearity='relu'): std = sqrt(2/fan_out)
        std = jnp.sqrt(2.0 / fan_out)
        # stored as [in, out] (PyTorch W.T) for x @ W layout
        return std * jax.random.normal(k, (fan_in, fan_out), jnp.float32)

    def bias(k, n):
        return 0.01 * jax.random.normal(k, (1, n), jnp.float32)

    return {
        "w1":  kaiming(ks[0], 49, 128),  "b1":  bias(ks[1], 128),
        "w2":  kaiming(ks[2], 128, 128), "b2":  bias(ks[3], 128),
        "wsh": kaiming(ks[4], 128, 128), "bsh": bias(ks[5], 128),
        "wsp": kaiming(ks[6], 128, 128), "bsp": bias(ks[7], 128),
        "wc1": kaiming(ks[8], 128, 1),   "bc1": bias(ks[9], 1),
        "weight": jax.random.normal(ks[10], (2,), jnp.float32),
    }


def reference_forward(t, p):
    """Uncollapsed pure-JAX reference matching the PyTorch module (eval mode)."""
    f32 = jnp.float32
    h = jnp.dot(t, p["w1"].astype(t.dtype), preferred_element_type=f32) + p["b1"]
    h = jnp.maximum(h, 0.0)
    h = h @ p["w2"] + p["b2"]
    t_sh = h @ p["wsh"] + p["bsh"]
    t_sp = h @ p["wsp"] + p["bsp"]
    w = jax.nn.softmax(p["weight"], axis=-1)
    fusion = w[0] * t_sp + w[1] * t_sh
    return fusion @ p["wc1"] + p["bc1"]


if __name__ == "__main__":
    key = jax.random.PRNGKey(0)
    k_param, k_t1, k_t2 = jax.random.split(key, 3)

    params = init_params(k_param)

    # Test 1: small batch, f32 streamed input, single tile.
    B1 = 8
    t1 = jax.random.normal(k_t1, (B1, 49), jnp.float32)
    out1 = jax.block_until_ready(stageone2_tab_forward(t1, params))
    ref1 = reference_forward(t1, params)
    assert out1.shape == (B1, 1)
    # Loose-ish tolerance: kernel and XLA reference may use different MXU
    # accumulation orders / f32-matmul pass counts.
    assert jnp.allclose(out1, ref1, atol=1e-2, rtol=1e-2)

    # Test 2: multi-tile grid with batch padding + bf16 streamed input
    # (producer-provided bf16: no wrapper-side cast, half the HBM read traffic).
    B2 = 300
    t2 = jax.random.normal(k_t2, (B2, 49), jnp.float32).astype(jnp.bfloat16)
    out2 = jax.block_until_ready(stageone2_tab_forward(t2, params, tile_b=128))
    ref2 = reference_forward(t2, params)
    assert out2.shape == (B2, 1)
    assert jnp.allclose(out2, ref2, atol=1e-2, rtol=1e-2)

    print("KERNEL_OK")
</pallas_src>

<mosaic_0001>
module attributes {stable_mosaic.version = 11 : i64} {
  func.func @stageone2_tab_kernel(%arg0: i32, %arg1: memref<8x49xf32, #tpu.memory_space<vmem>>, %arg2: memref<49x128xf32, #tpu.memory_space<vmem>>, %arg3: memref<1x128xf32, #tpu.memory_space<vmem>>, %arg4: memref<128x1xf32, #tpu.memory_space<vmem>>, %arg5: memref<1x1xf32, #tpu.memory_space<smem>>, %arg6: memref<8x1xf32, #tpu.memory_space<vmem>>) attributes {dimension_semantics = [#tpu.dimension_semantics<parallel>], iteration_bounds = array<i64: 1>, scalar_prefetch = 0 : i64, scratch_operands = 0 : i64, tpu.core_type = #tpu.core_type<tc>, window_params = [{transform_indices = @transform_0, window_bounds = array<i64: 8, 49>}, {pipeline_mode = #tpu.pipeline_mode<synchronous>, transform_indices = @transform_1, window_bounds = array<i64: 49, 128>}, {pipeline_mode = #tpu.pipeline_mode<synchronous>, transform_indices = @transform_2, window_bounds = array<i64: 1, 128>}, {pipeline_mode = #tpu.pipeline_mode<synchronous>, transform_indices = @transform_3, window_bounds = array<i64: 128, 1>}, {transform_indices = @transform_4, window_bounds = array<i64: 1, 1>}, {transform_indices = @transform_5, window_bounds = array<i64: 8, 1>}]} {
    %c0 = arith.constant 0 : index
    %c0_0 = arith.constant 0 : index
    %0 = vector.load %arg1[%c0, %c0_0] : memref<8x49xf32, #tpu.memory_space<vmem>>, vector<8x49xf32>
    %c0_1 = arith.constant 0 : index
    %c0_2 = arith.constant 0 : index
    %1 = vector.load %arg2[%c0_1, %c0_2] : memref<49x128xf32, #tpu.memory_space<vmem>>, vector<49x128xf32>
    %cst = arith.constant dense<0.000000e+00> : vector<8x128xf32>
    %2 = tpu.matmul %0, %1, %cst {dimension_numbers = #tpu.dot_dimension_numbers<[1], [0], [0], [1], [0, 0, 1, 1], [], []>} : vector<8x49xf32>, vector<49x128xf32>, vector<8x128xf32> -> vector<8x128xf32>
    %c0_3 = arith.constant 0 : index
    %c0_4 = arith.constant 0 : index
    %3 = vector.load %arg3[%c0_3, %c0_4] : memref<1x128xf32, #tpu.memory_space<vmem>>, vector<1x128xf32>
    %4 = vector.broadcast %3 : vector<1x128xf32> to vector<8x128xf32>
    %5 = arith.addf %2, %4 : vector<8x128xf32>
    %cst_5 = arith.constant 0.000000e+00 : f32
    %6 = vector.broadcast %cst_5 : f32 to vector<8x128xf32>
    %7 = arith.maximumf %5, %6 : vector<8x128xf32>
    %c0_6 = arith.constant 0 : index
    %c0_7 = arith.constant 0 : index
    %8 = vector.load %arg4[%c0_6, %c0_7] : memref<128x1xf32, #tpu.memory_space<vmem>>, vector<128x1xf32>
    %cst_8 = arith.constant dense<0.000000e+00> : vector<8x1xf32>
    %9 = tpu.matmul %7, %8, %cst_8 {dimension_numbers = #tpu.dot_dimension_numbers<[1], [0], [0], [1], [0, 0, 1, 1], [], []>} : vector<8x128xf32>, vector<128x1xf32>, vector<8x1xf32> -> vector<8x1xf32>
    %c0_9 = arith.constant 0 : index
    %c0_10 = arith.constant 0 : index
    %10 = memref.load %arg5[%c0_9, %c0_10] : memref<1x1xf32, #tpu.memory_space<smem>>
    %11 = vector.broadcast %10 : f32 to vector<8x1xf32>
    %12 = arith.addf %9, %11 : vector<8x1xf32>
    %c0_11 = arith.constant 0 : index
    %c0_12 = arith.constant 0 : index
    %13 = vector.load %arg6[%c0_11, %c0_12] : memref<8x1xf32, #tpu.memory_space<vmem>>, vector<8x1xf32>
    tpu.vector_store %arg6[%c0_11, %c0_12], %12 {strides = array<i32>} : memref<8x1xf32, #tpu.memory_space<vmem>>, vector<8x1xf32>,
    return
  }
  func.func @transform_0(%arg0: i32) -> (i32, i32) {
    %c0_i32 = arith.constant 0 : i32
    %c0_i32_0 = arith.constant 0 : i32
    return %arg0, %c0_i32 : i32, i32
  }
  func.func @transform_1(%arg0: i32) -> (i32, i32) {
    %c0_i32 = arith.constant 0 : i32
    %c0_i32_0 = arith.constant 0 : i32
    %c0_i32_1 = arith.constant 0 : i32
    return %c0_i32, %c0_i32_0 : i32, i32
  }
  func.func @transform_2(%arg0: i32) -> (i32, i32) {
    %c0_i32 = arith.constant 0 : i32
    %c0_i32_0 = arith.constant 0 : i32
    %c0_i32_1 = arith.constant 0 : i32
    return %c0_i32, %c0_i32_0 : i32, i32
  }
  func.func @transform_3(%arg0: i32) -> (i32, i32) {
    %c0_i32 = arith.constant 0 : i32
    %c0_i32_0 = arith.constant 0 : i32
    %c0_i32_1 = arith.constant 0 : i32
    return %c0_i32, %c0_i32_0 : i32, i32
  }
  func.func @transform_4(%arg0: i32) -> (i32, i32) {
    %c0_i32 = arith.constant 0 : i32
    %c0_i32_0 = arith.constant 0 : i32
    %c0_i32_1 = arith.constant 0 : i32
    return %c0_i32, %c0_i32_0 : i32, i32
  }
  func.func @transform_5(%arg0: i32) -> (i32, i32) {
    %c0_i32 = arith.constant 0 : i32
    %c0_i32_0 = arith.constant 0 : i32
    return %arg0, %c0_i32 : i32, i32
  }
}

</mosaic_0001>

<bundles_post_ra>
// kernel: tpu_custom_call.1
= control target key start
LH: loop header
LB: loop body
LE: loop exit
PB: predicated region body
PF: predicated region fallthrough
CT: control target
= control target key end

     0   :  { %v325_v0 = vmov 0.0|0.0   ;;  %vm326_vm0 = vmmov 0   ;;  %v327_v4 = vmov 0.0   ;;  %vm40_vm1 = vcmask 1040384   ;;  %s439_s1 = inlined_call_operand.vmem [shape: f32[49,128], index: 1, kind: input, shape index: {}]   ;;  %s440_s3 = inlined_call_operand.vmem [shape: f32[128,1], index: 3, kind: input, shape index: {}]   ;;  %s441_s0 = inlined_call_operand.vmem [shape: f32[8,49], index: 0, kind: input, shape index: {}]   ;;  %s442_s2 = inlined_call_operand.vmem [shape: f32[1,128], index: 2, kind: input, shape index: {}]   ;;  %s443_s4 = inlined_call_operand.<no memory space> [shape: f32[1,1], index: 4, kind: input, shape index: {}]   ;;  %s444_s5 = inlined_call_operand.vmem [shape: f32[8,1], index: 5, kind: output, shape index: {}]  }
   0x1   :  { %289 = vmatprep.subr.bf16.mxu0 %v325_v0  ;;  %v22_v1 = vld [vmem:[%s439_s1] sm:$0xff]  ;;  %v23_v2 = vld [vmem:[%s439_s1 + $0x8] sm:$0xff]  ;;  %v24_v3 = vld [vmem:[%s439_s1 + $0x10] sm:$0xff]  ;;  %251 = vmatprep.mubr.msk.f32.mxu0 %vm326_vm0, %v327_v4  ;;  %vm36_vm2 = vcmask 400384   ;;  %v132_v42 = vstv %s443_s4  ;;  %vm203_vm3 = vcmask 7168  }
   0x2   :  { %v290_v5 = vpack.c.bf16 %v23_v2, %v22_v1  ;;  %v25_v6 = vld [vmem:[%s439_s1 + $0x18] sm:$0xff]  ;;  %298 = vmatprep.subr.bf16.mxu1 %v325_v0  ;;  %286 = vmatprep.mubr.msk.f32.mxu1 %vm326_vm0, %v327_v4  ;;  %v115_v7 = vld [vmem:[%s440_s3] sm:$0xff]  ;;  %v116_v9 = vld [vmem:[%s440_s3 + $0x8] sm:$0xff] }
   0x3   :  { %v293_v8 = vpack.c.bf16 %v25_v6, %v24_v3  ;;  %v117_v10 = vld [vmem:[%s440_s3 + $0x10] sm:$0xff]  ;;  %v118_v11 = vld [vmem:[%s440_s3 + $0x18] sm:$0xff]  ;;  %v26_v12 = vld [vmem:[%s439_s1 + $0x20] sm:$0xff]  ;;  %v299_v14 = vpack.c.bf16 %v116_v9, %v115_v7 }
   0x4   :  { %291 = vmatpush3.bf16.msra.mxu0 %v290_v5  ;;  %v27_v13 = vld [vmem:[%s439_s1 + $0x28] sm:$0xff]  ;;  %v302_v15 = vpack.c.bf16 %v118_v11, %v117_v10  ;;  %v119_v17 = vld [vmem:[%s440_s3 + $0x20] sm:$0xff]  ;;  %v121_v20 = vld [vmem:[%s440_s3 + $0x30] sm:$0xff] }
   0x5   :  { %292 = vmatprep.subr.bf16.mxu0 %v325_v0  ;;  %300 = vmatpush3.bf16.msra.mxu1 %v299_v14  ;;  %v296_v16 = vpack.c.bf16 %v27_v13, %v26_v12  ;;  %v120_v18 = vld [vmem:[%s440_s3 + $0x28] sm:$0xff]  ;;  %v122_v21 = vld [vmem:[%s440_s3 + $0x38] sm:$0xff]  ;;  %v28_v22 = vld [vmem:[%s439_s1 + $0x30] sm:$0x1] }
   0x6   :  { %301 = vmatprep.subr.bf16.mxu1 %v325_v0  ;;  %v305_v19 = vpack.c.bf16 %v120_v18, %v119_v17  ;;  %v21_v23 = vld [vmem:[%s441_s0] sm:$0xff]  ;;  %v308_v24 = vpack.c.bf16 %v122_v21, %v121_v20  ;;  %v124_v26 = vld [vmem:[%s440_s3 + $0x48] sm:$0xff]  ;;  %v125_v28 = vld [vmem:[%s440_s3 + $0x50] sm:$0xff] }
   0x7   :  { %v123_v25 = vld [vmem:[%s440_s3 + $0x40] sm:$0xff]  ;;  %v126_v29 = vld [vmem:[%s440_s3 + $0x58] sm:$0xff]  ;;  %v128_v32 = vld [vmem:[%s440_s3 + $0x68] sm:$0xff] }
   0x8   :  { %294 = vmatpush3.bf16.msra.mxu0 %v293_v8  ;;  %v311_v27 = vpack.c.bf16 %v124_v26, %v123_v25  ;;  %v314_v30 = vpack.c.bf16 %v126_v29, %v125_v28  ;;  %v127_v31 = vld [vmem:[%s440_s3 + $0x60] sm:$0xff]  ;;  %v129_v34 = vld [vmem:[%s440_s3 + $0x70] sm:$0xff]  ;;  %v130_v35 = vld [vmem:[%s440_s3 + $0x78] sm:$0xff] }
   0x9   :  { %295 = vmatprep.subr.bf16.mxu0 %v325_v0  ;;  %303 = vmatpush3.bf16.msra.mxu1 %v302_v15  ;;  %v317_v33 = vpack.c.bf16 %v128_v32, %v127_v31  ;;  %v320_v36 = vpack.c.bf16 %v130_v35, %v129_v34  ;;  %v209_v37 = vld [vmem:[%s442_s2] ss:$0 sm:$0xff] }
   0xa   :  { %304 = vmatprep.subr.bf16.mxu1 %v325_v0 }
   0xc   :  { %297 = vmatpush3.bf16.msra.mxu0 %v296_v16 }
   0xd   :  { %249 = vmatprep.subr.mxu0 %v327_v4  ;;  %306 = vmatpush3.bf16.msra.mxu1 %v305_v19 }
   0xe   :  { %307 = vmatprep.subr.bf16.mxu1 %v325_v0 }
  0x10   :  { %250 = vmatpush3.msk.msra.mxu0 %vm40_vm1, %v28_v22 }
  0x11   :  { %252 = vmatmul.mubr.msk.f32.vlgmr.msra.gmra.mrb[0].mxu0 %vm36_vm2, %v21_v23  ;;  %309 = vmatpush3.bf16.msra.mxu1 %v308_v24 }
  0x12   :  { %310 = vmatprep.subr.bf16.mxu1 %v325_v0 }
  0x15   :  { %312 = vmatpush3.bf16.msra.mxu1 %v311_v27 }
  0x16   :  { %313 = vmatprep.subr.bf16.mxu1 %v325_v0 }
  0x19   :  { %315 = vmatpush3.bf16.msra.mxu1 %v314_v30 }
  0x1a   :  { %316 = vmatprep.subr.bf16.mxu1 %v325_v0 }
  0x1d   :  { %318 = vmatpush3.bf16.msra.mxu1 %v317_v33 }
  0x1e   :  { %319 = vmatprep.subr.bf16.mxu1 %v325_v0 }
  0x21   :  { %321 = vmatpush3.bf16.msra.mxu1 %v320_v36 }
  0xe4   :  { %v110_v38 = vpop.f32.mrb[0].mxu0 }
  0xe5   :  { %v111_v39 = vadd.f32 %v209_v37, %v110_v38  ;;  %v253_v40 = vpop.f32.mrb[1].mxu0 }
  0xe7   :  { %v114_v41 = vmax.f32 %v111_v39, 0.0 }
  0xe9   :  { %287 = vmatmul.mubr.f32.vlgmr.msra.gmra.mrb[0].mxu1 %v114_v41 }
 0x1bc   :  { %v199_v43 = vpop.f32.mrb[0].mxu1 }
 0x1bd   :  { %v200_v44 = vadd.f32 %v199_v43, %v132_v42  ;;  %v288_v45 = vpop.f32.mrb[1].mxu1 }
 0x1bf   :  { %204 = vst.msk [vmem:[%s444_s5] sm:$0xff] %vm203_vm3, %v200_v44 }

</bundles_post_ra>
